<compile_context>
chip_gen: v6e
topology: v6e:2x2x1
jax: 0.10.0
libtpu: 0.0.40
codegen_flags: <defaults>
</compile_context>

<pallas_src>
import functools

import jax
import jax.numpy as jnp
import numpy as np
from jax.experimental import pallas as pl
from jax.experimental.pallas import tpu as pltpu


def _pick_row_tile(n, target=256):
    """Largest divisor of n that is <= target and a multiple of 8 (else n)."""
    if n <= target:
        return n
    for tm in range(target, 7, -1):
        if n % tm == 0 and tm % 8 == 0:
            return tm
    return n


# ----------------------------------------------------------------------------
# Kernel 1: fused qkv projection + RoPE + per-token attention over heads
# ----------------------------------------------------------------------------
def _rope_attn_kernel(x_ref, w_ref, b_ref, cos_ref, sin_ref,
                      ssum_ref, sexp_ref, sgat_ref, o_ref,
                      *, num_heads, head_dim):
    H, hd = num_heads, head_dim
    D = H * hd

    # Single long MXU pass: (TM, D) @ (D, 5D), bf16 operands, f32 accumulation.
    proj = jnp.dot(x_ref[...], w_ref[...],
                   preferred_element_type=jnp.float32) + b_ref[...]     # (TM, 5D)
    qa = proj[:, 0 * D:1 * D]
    qb = proj[:, 1 * D:2 * D]
    ka = proj[:, 2 * D:3 * D]
    kb = proj[:, 3 * D:4 * D]
    v = proj[:, 4 * D:5 * D]

    # RoPE: even/odd gather is baked into the weight columns -> pure f32 FMA.
    cosf = jnp.concatenate([cos_ref[...]] * H, axis=1)                  # (TM, D)
    sinf = jnp.concatenate([sin_ref[...]] * H, axis=1)                  # (TM, D)
    q = qa * cosf + qb * sinf
    k = ka * cosf + kb * sinf

    ssum = ssum_ref[...]        # (D, H)  f32, softmax scale folded in
    sexp = sexp_ref[...]        # (H, D)  f32
    sgat = sgat_ref[...]        # (D, hd) bf16

    # Attention over the HEADS axis per token (as written in the module),
    # with the per-head segment sums done on the MXU via selector matmuls.
    for i in range(H):
        qi = q[:, i * hd:(i + 1) * hd]                                  # (TM, hd)
        qi_b = jnp.concatenate([qi] * H, axis=1)                        # (TM, D)
        s = jnp.dot(qi_b * k, ssum,
                    preferred_element_type=jnp.float32)                 # (TM, H) scaled
        m = jnp.max(s, axis=1, keepdims=True)
        e = jnp.exp(s - m)
        w = e * pl.reciprocal(jnp.sum(e, axis=1, keepdims=True), approx=True)
        w_exp = jnp.dot(w, sexp, preferred_element_type=jnp.float32)    # (TM, D)
        out_i = jnp.dot((w_exp * v).astype(jnp.bfloat16), sgat,
                        preferred_element_type=jnp.float32)             # (TM, hd)
        o_ref[i] = out_i.astype(o_ref.dtype)                            # head-major layout


# ----------------------------------------------------------------------------
# Kernel 2: output Linear projection (row-tiled over B*T)
# ----------------------------------------------------------------------------
def _out_linear_kernel(a_ref, w_ref, b_ref, o_ref):
    o_ref[...] = (jnp.dot(a_ref[...], w_ref[...],
                          preferred_element_type=jnp.float32) + b_ref[...])


# ----------------------------------------------------------------------------
# Wrapper (parameter setup / layout glue in plain JAX)
# ----------------------------------------------------------------------------
def rope_mha_forward(x, params, num_heads):
    B, T, D = x.shape
    H = num_heads
    hd = D // H
    half = hd // 2
    scale = hd ** -0.5

    Wqkv, bqkv = params["Wqkv"], params["bqkv"]      # (D, 3D), (3D,)  (x @ W + b)
    Wout, bout = params["Wout"], params["bout"]      # (D, D),  (D,)

    Wq, Wk, Wv = Wqkv[:, :D], Wqkv[:, D:2 * D], Wqkv[:, 2 * D:]
    bq, bk, bv = bqkv[:D], bqkv[D:2 * D], bqkv[2 * D:]

    # Column permutations that bake the RoPE even/odd gather into the weights.
    # Output column c = h*hd + p*half + j:
    #   cos-term source column -> h*hd + 2j + p
    #   sin-term source column -> h*hd + 2j + (1-p)
    perm_cos = np.zeros((D,), np.int32)
    perm_sin = np.zeros((D,), np.int32)
    for h in range(H):
        for p in range(2):
            for j in range(half):
                c = h * hd + p * half + j
                perm_cos[c] = h * hd + 2 * j + p
                perm_sin[c] = h * hd + 2 * j + (1 - p)

    # Fused projection weight (D, 5D) in bf16; bias stays f32.
    W_all = jnp.concatenate(
        [Wq[:, perm_cos], Wq[:, perm_sin], Wk[:, perm_cos], Wk[:, perm_sin], Wv],
        axis=1).astype(jnp.bfloat16)
    b_all = jnp.concatenate(
        [bq[perm_cos], bq[perm_sin], bk[perm_cos], bk[perm_sin], bv]
    ).reshape(1, 5 * D).astype(jnp.float32)

    # Compact per-head RoPE cache (T, hd): [cos|cos] and [-sin|+sin] halves.
    pos = jnp.arange(T, dtype=jnp.float32)[:, None]
    dim_idx = jnp.arange(0, hd, 2, dtype=jnp.float32)
    freqs = 1.0 / (10000.0 ** (dim_idx / hd))
    phase = pos * freqs                                        # (T, hd//2)
    sin, cos = jnp.sin(phase), jnp.cos(phase)
    cos_hd = jnp.concatenate([cos, cos], axis=1)               # (T, hd)
    sin_hd = jnp.concatenate([-sin, sin], axis=1)              # (T, hd)

    # Constant head-selector matrices for the MXU attention phase.
    sel_np = np.zeros((D, H), np.float32)
    for j in range(H):
        sel_np[j * hd:(j + 1) * hd, j] = 1.0
    sel_sum = jnp.asarray(sel_np * scale, jnp.float32)         # (D, H), scale folded in
    sel_exp = jnp.asarray(sel_np.T, jnp.float32)               # (H, D)
    sel_gat = jnp.asarray(np.tile(np.eye(hd, dtype=np.float32), (H, 1)),
                          jnp.bfloat16)                        # (D, hd)

    TM = _pick_row_tile(T, 256)                                # row tile over tokens
    grid = (B, T // TM)

    const2d = lambda shape: pl.BlockSpec(shape, lambda b, t: (0, 0))

    attn = pl.pallas_call(
        functools.partial(_rope_attn_kernel, num_heads=H, head_dim=hd),
        out_shape=jax.ShapeDtypeStruct((B, H, T, hd), jnp.bfloat16),
        grid=grid,
        in_specs=[
            pl.BlockSpec((None, TM, D), lambda b, t: (b, t, 0)),    # x tile
            const2d((D, 5 * D)),                                    # W_all (constant)
            const2d((1, 5 * D)),                                    # b_all
            pl.BlockSpec((TM, hd), lambda b, t: (t, 0)),            # cos
            pl.BlockSpec((TM, hd), lambda b, t: (t, 0)),            # signed sin
            const2d((D, H)),                                        # sel_sum
            const2d((H, D)),                                        # sel_exp
            const2d((D, hd)),                                       # sel_gat
        ],
        out_specs=pl.BlockSpec((None, H, TM, hd), lambda b, t: (b, 0, t, 0)),
        compiler_params=pltpu.CompilerParams(
            dimension_semantics=("parallel", "parallel"),
            vmem_limit_bytes=64 * 1024 * 1024),
    )(x.astype(jnp.bfloat16), W_all, b_all, cos_hd, sin_hd,
      sel_sum, sel_exp, sel_gat)

    # Reference's out.transpose(1,2).reshape(B,T,D): with the (B,H,T,hd) output
    # layout this is a free contiguous reshape (no HBM transpose pass).
    scrambled = attn.reshape(B * T, D)

    TN = _pick_row_tile(B * T, 512)
    y2d = pl.pallas_call(
        _out_linear_kernel,
        out_shape=jax.ShapeDtypeStruct((B * T, D), jnp.float32),
        grid=(B * T // TN,),
        in_specs=[
            pl.BlockSpec((TN, D), lambda i: (i, 0)),
            pl.BlockSpec((D, D), lambda i: (0, 0)),
            pl.BlockSpec((1, D), lambda i: (0, 0)),
        ],
        out_specs=pl.BlockSpec((TN, D), lambda i: (i, 0)),
        compiler_params=pltpu.CompilerParams(
            dimension_semantics=("parallel",),
            vmem_limit_bytes=64 * 1024 * 1024),
    )(scrambled, Wout.astype(jnp.bfloat16),
      bout.reshape(1, D).astype(jnp.float32))

    return y2d.reshape(B, T, D)


# ----------------------------------------------------------------------------
# Pure-JAX reference (line-by-line port of the PyTorch module) for validation
# ----------------------------------------------------------------------------
def reference_forward(x, params, num_heads):
    B, T, D = x.shape
    hd = D // num_heads
    qkv = x @ params["Wqkv"] + params["bqkv"]               # (B, T, 3D)
    qkv = qkv.reshape(B, T, 3, num_heads, hd)
    q, k, v = qkv[:, :, 0], qkv[:, :, 1], qkv[:, :, 2]

    pos = jnp.arange(T, dtype=jnp.float32)[:, None]
    dim_idx = jnp.arange(0, hd, 2, dtype=jnp.float32)
    freqs = 1.0 / (10000.0 ** (dim_idx / hd))
    phase = pos * freqs
    sin = jnp.sin(phase)[None, :, None, :]
    cos = jnp.cos(phase)[None, :, None, :]

    def rope(t):
        t1, t2 = t[..., 0::2], t[..., 1::2]
        return jnp.concatenate([t1 * cos - t2 * sin, t1 * sin + t2 * cos], axis=-1)

    q, k = rope(q), rope(k)
    scores = jnp.einsum("bthd,btgd->bthg", q, k) * (hd ** -0.5)
    w = jax.nn.softmax(scores, axis=-1)
    out = jnp.einsum("bthg,btgd->bthd", w, v)
    out = jnp.transpose(out, (0, 2, 1, 3)).reshape(B, T, D)
    return out @ params["Wout"] + params["bout"]


if __name__ == "__main__":
    B, T, D, H = 2, 8, 32, 4
    key = jax.random.PRNGKey(0)
    k1, k2, k3, k4, k5 = jax.random.split(key, 5)

    x = jax.random.normal(k1, (B, T, D), jnp.float32)
    params = {
        "Wqkv": jax.random.normal(k2, (D, 3 * D), jnp.float32) / np.sqrt(D),
        "bqkv": jax.random.normal(k3, (3 * D,), jnp.float32) * 0.1,
        "Wout": jax.random.normal(k4, (D, D), jnp.float32) / np.sqrt(D),
        "bout": jax.random.normal(k5, (D,), jnp.float32) * 0.1,
    }

    y = rope_mha_forward(x, params, H)
    jax.block_until_ready(y)

    y_ref = reference_forward(x, params, H)
    np.testing.assert_allclose(np.asarray(y), np.asarray(y_ref), rtol=3e-2, atol=3e-2)
    print("KERNEL_OK")
</pallas_src>

<mosaic_0001>
module attributes {stable_mosaic.version = 11 : i64} {
  func.func @_rope_attn_kernel(%arg0: i32, %arg1: i32, %arg2: memref<1x8x32xbf16, #tpu.memory_space<vmem>>, %arg3: memref<32x160xbf16, #tpu.memory_space<vmem>>, %arg4: memref<1x160xf32, #tpu.memory_space<vmem>>, %arg5: memref<8x8xf32, #tpu.memory_space<vmem>>, %arg6: memref<8x8xf32, #tpu.memory_space<vmem>>, %arg7: memref<32x4xf32, #tpu.memory_space<vmem>>, %arg8: memref<4x32xf32, #tpu.memory_space<vmem>>, %arg9: memref<32x8xbf16, #tpu.memory_space<vmem>>, %arg10: memref<1x4x8x8xbf16, #tpu.memory_space<vmem>>) attributes {dimension_semantics = [#tpu.dimension_semantics<parallel>, #tpu.dimension_semantics<parallel>], iteration_bounds = array<i64: 2, 1>, scalar_prefetch = 0 : i64, scratch_operands = 0 : i64, tpu.core_type = #tpu.core_type<tc>, window_params = [{transform_indices = @transform_0, window_bounds = array<i64: 1, 8, 32>}, {pipeline_mode = #tpu.pipeline_mode<synchronous>, transform_indices = @transform_1, window_bounds = array<i64: 32, 160>}, {pipeline_mode = #tpu.pipeline_mode<synchronous>, transform_indices = @transform_2, window_bounds = array<i64: 1, 160>}, {transform_indices = @transform_3, window_bounds = array<i64: 8, 8>}, {transform_indices = @transform_4, window_bounds = array<i64: 8, 8>}, {pipeline_mode = #tpu.pipeline_mode<synchronous>, transform_indices = @transform_5, window_bounds = array<i64: 32, 4>}, {pipeline_mode = #tpu.pipeline_mode<synchronous>, transform_indices = @transform_6, window_bounds = array<i64: 4, 32>}, {pipeline_mode = #tpu.pipeline_mode<synchronous>, transform_indices = @transform_7, window_bounds = array<i64: 32, 8>}, {transform_indices = @transform_8, window_bounds = array<i64: 1, 4, 8, 8>}]} {
    %c0 = arith.constant 0 : index
    %c0_0 = arith.constant 0 : index
    %c0_1 = arith.constant 0 : index
    %0 = vector.load %arg2[%c0, %c0_0, %c0_1] : memref<1x8x32xbf16, #tpu.memory_space<vmem>>, vector<1x8x32xbf16>
    %1 = vector.shape_cast %0 : vector<1x8x32xbf16> to vector<8x32xbf16>
    %c0_2 = arith.constant 0 : index
    %c0_3 = arith.constant 0 : index
    %2 = vector.load %arg3[%c0_2, %c0_3] : memref<32x160xbf16, #tpu.memory_space<vmem>>, vector<32x160xbf16>
    %cst = arith.constant dense<0.000000e+00> : vector<8x160xf32>
    %3 = tpu.matmul %1, %2, %cst {dimension_numbers = #tpu.dot_dimension_numbers<[1], [0], [0], [1], [0, 0, 1, 1], [], []>} : vector<8x32xbf16>, vector<32x160xbf16>, vector<8x160xf32> -> vector<8x160xf32>
    %c0_4 = arith.constant 0 : index
    %c0_5 = arith.constant 0 : index
    %4 = vector.load %arg4[%c0_4, %c0_5] : memref<1x160xf32, #tpu.memory_space<vmem>>, vector<1x160xf32>
    %5 = vector.broadcast %4 : vector<1x160xf32> to vector<8x160xf32>
    %6 = arith.addf %3, %5 : vector<8x160xf32>
    %7 = vector.extract_strided_slice %6 {offsets = [0, 0], sizes = [8, 32], strides = [1, 1]} : vector<8x160xf32> to vector<8x32xf32>
    %8 = vector.extract_strided_slice %6 {offsets = [0, 32], sizes = [8, 32], strides = [1, 1]} : vector<8x160xf32> to vector<8x32xf32>
    %9 = vector.extract_strided_slice %6 {offsets = [0, 64], sizes = [8, 32], strides = [1, 1]} : vector<8x160xf32> to vector<8x32xf32>
    %10 = vector.extract_strided_slice %6 {offsets = [0, 96], sizes = [8, 32], strides = [1, 1]} : vector<8x160xf32> to vector<8x32xf32>
    %11 = vector.extract_strided_slice %6 {offsets = [0, 128], sizes = [8, 32], strides = [1, 1]} : vector<8x160xf32> to vector<8x32xf32>
    %c0_6 = arith.constant 0 : index
    %c0_7 = arith.constant 0 : index
    %12 = vector.load %arg5[%c0_6, %c0_7] : memref<8x8xf32, #tpu.memory_space<vmem>>, vector<8x8xf32>
    %13 = tpu.concatenate %12, %12, %12, %12 in 1 : vector<8x8xf32>, vector<8x8xf32>, vector<8x8xf32>, vector<8x8xf32> -> vector<8x32xf32>
    %c0_8 = arith.constant 0 : index
    %c0_9 = arith.constant 0 : index
    %14 = vector.load %arg6[%c0_8, %c0_9] : memref<8x8xf32, #tpu.memory_space<vmem>>, vector<8x8xf32>
    %15 = tpu.concatenate %14, %14, %14, %14 in 1 : vector<8x8xf32>, vector<8x8xf32>, vector<8x8xf32>, vector<8x8xf32> -> vector<8x32xf32>
    %16 = arith.mulf %7, %13 : vector<8x32xf32>
    %17 = arith.mulf %8, %15 : vector<8x32xf32>
    %18 = arith.addf %16, %17 : vector<8x32xf32>
    %19 = arith.mulf %9, %13 : vector<8x32xf32>
    %20 = arith.mulf %10, %15 : vector<8x32xf32>
    %21 = arith.addf %19, %20 : vector<8x32xf32>
    %c0_10 = arith.constant 0 : index
    %c0_11 = arith.constant 0 : index
    %22 = vector.load %arg7[%c0_10, %c0_11] : memref<32x4xf32, #tpu.memory_space<vmem>>, vector<32x4xf32>
    %c0_12 = arith.constant 0 : index
    %c0_13 = arith.constant 0 : index
    %23 = vector.load %arg8[%c0_12, %c0_13] : memref<4x32xf32, #tpu.memory_space<vmem>>, vector<4x32xf32>
    %c0_14 = arith.constant 0 : index
    %c0_15 = arith.constant 0 : index
    %24 = vector.load %arg9[%c0_14, %c0_15] : memref<32x8xbf16, #tpu.memory_space<vmem>>, vector<32x8xbf16>
    %25 = vector.extract_strided_slice %18 {offsets = [0, 0], sizes = [8, 8], strides = [1, 1]} : vector<8x32xf32> to vector<8x8xf32>
    %26 = tpu.concatenate %25, %25, %25, %25 in 1 : vector<8x8xf32>, vector<8x8xf32>, vector<8x8xf32>, vector<8x8xf32> -> vector<8x32xf32>
    %27 = arith.mulf %26, %21 : vector<8x32xf32>
    %cst_16 = arith.constant dense<0.000000e+00> : vector<8x4xf32>
    %28 = tpu.matmul %27, %22, %cst_16 {dimension_numbers = #tpu.dot_dimension_numbers<[1], [0], [0], [1], [0, 0, 1, 1], [], []>} : vector<8x32xf32>, vector<32x4xf32>, vector<8x4xf32> -> vector<8x4xf32>
    %cst_17 = arith.constant dense<0xFF800000> : vector<8xf32>
    %29 = vector.multi_reduction <maximumf>, %28, %cst_17 [1] : vector<8x4xf32> to vector<8xf32>
    %30 = vector.shape_cast %29 : vector<8xf32> to vector<8x1xf32>
    %31 = vector.broadcast %30 : vector<8x1xf32> to vector<8x4xf32>
    %32 = arith.subf %28, %31 : vector<8x4xf32>
    %33 = math.exp %32 : vector<8x4xf32>
    %cst_18 = arith.constant dense<0.000000e+00> : vector<8xf32>
    %34 = vector.multi_reduction <add>, %33, %cst_18 [1] : vector<8x4xf32> to vector<8xf32>
    %35 = vector.shape_cast %34 : vector<8xf32> to vector<8x1xf32>
    %36 = tpu.reciprocal %35 {approx = true} : vector<8x1xf32> -> vector<8x1xf32>
    %37 = vector.broadcast %36 : vector<8x1xf32> to vector<8x4xf32>
    %38 = arith.mulf %33, %37 : vector<8x4xf32>
    %cst_19 = arith.constant dense<0.000000e+00> : vector<8x32xf32>
    %39 = tpu.matmul %38, %23, %cst_19 {dimension_numbers = #tpu.dot_dimension_numbers<[1], [0], [0], [1], [0, 0, 1, 1], [], []>} : vector<8x4xf32>, vector<4x32xf32>, vector<8x32xf32> -> vector<8x32xf32>
    %40 = arith.mulf %39, %11 : vector<8x32xf32>
    %41 = arith.truncf %40 : vector<8x32xf32> to vector<8x32xbf16>
    %cst_20 = arith.constant dense<0.000000e+00> : vector<8x8xf32>
    %42 = tpu.matmul %41, %24, %cst_20 {dimension_numbers = #tpu.dot_dimension_numbers<[1], [0], [0], [1], [0, 0, 1, 1], [], []>} : vector<8x32xbf16>, vector<32x8xbf16>, vector<8x8xf32> -> vector<8x8xf32>
    %43 = arith.truncf %42 : vector<8x8xf32> to vector<8x8xbf16>
    %c0_21 = arith.constant 0 : index
    %c0_22 = arith.constant 0 : index
    %c0_23 = arith.constant 0 : index
    %c0_24 = arith.constant 0 : index
    %44 = vector.load %arg10[%c0_21, %c0_22, %c0_23, %c0_24] : memref<1x4x8x8xbf16, #tpu.memory_space<vmem>>, vector<1x1x8x8xbf16>
    %45 = vector.shape_cast %44 : vector<1x1x8x8xbf16> to vector<8x8xbf16>
    %46 = vector.shape_cast %43 : vector<8x8xbf16> to vector<1x1x8x8xbf16>
    tpu.vector_store %arg10[%c0_21, %c0_22, %c0_23, %c0_24], %46 {strides = array<i32>} : memref<1x4x8x8xbf16, #tpu.memory_space<vmem>>, vector<1x1x8x8xbf16>,
    %47 = vector.extract_strided_slice %18 {offsets = [0, 8], sizes = [8, 8], strides = [1, 1]} : vector<8x32xf32> to vector<8x8xf32>
    %48 = tpu.concatenate %47, %47, %47, %47 in 1 : vector<8x8xf32>, vector<8x8xf32>, vector<8x8xf32>, vector<8x8xf32> -> vector<8x32xf32>
    %49 = arith.mulf %48, %21 : vector<8x32xf32>
    %cst_25 = arith.constant dense<0.000000e+00> : vector<8x4xf32>
    %50 = tpu.matmul %49, %22, %cst_25 {dimension_numbers = #tpu.dot_dimension_numbers<[1], [0], [0], [1], [0, 0, 1, 1], [], []>} : vector<8x32xf32>, vector<32x4xf32>, vector<8x4xf32> -> vector<8x4xf32>
    %cst_26 = arith.constant dense<0xFF800000> : vector<8xf32>
    %51 = vector.multi_reduction <maximumf>, %50, %cst_26 [1] : vector<8x4xf32> to vector<8xf32>
    %52 = vector.shape_cast %51 : vector<8xf32> to vector<8x1xf32>
    %53 = vector.broadcast %52 : vector<8x1xf32> to vector<8x4xf32>
    %54 = arith.subf %50, %53 : vector<8x4xf32>
    %55 = math.exp %54 : vector<8x4xf32>
    %cst_27 = arith.constant dense<0.000000e+00> : vector<8xf32>
    %56 = vector.multi_reduction <add>, %55, %cst_27 [1] : vector<8x4xf32> to vector<8xf32>
    %57 = vector.shape_cast %56 : vector<8xf32> to vector<8x1xf32>
    %58 = tpu.reciprocal %57 {approx = true} : vector<8x1xf32> -> vector<8x1xf32>
    %59 = vector.broadcast %58 : vector<8x1xf32> to vector<8x4xf32>
    %60 = arith.mulf %55, %59 : vector<8x4xf32>
    %cst_28 = arith.constant dense<0.000000e+00> : vector<8x32xf32>
    %61 = tpu.matmul %60, %23, %cst_28 {dimension_numbers = #tpu.dot_dimension_numbers<[1], [0], [0], [1], [0, 0, 1, 1], [], []>} : vector<8x4xf32>, vector<4x32xf32>, vector<8x32xf32> -> vector<8x32xf32>
    %62 = arith.mulf %61, %11 : vector<8x32xf32>
    %63 = arith.truncf %62 : vector<8x32xf32> to vector<8x32xbf16>
    %cst_29 = arith.constant dense<0.000000e+00> : vector<8x8xf32>
    %64 = tpu.matmul %63, %24, %cst_29 {dimension_numbers = #tpu.dot_dimension_numbers<[1], [0], [0], [1], [0, 0, 1, 1], [], []>} : vector<8x32xbf16>, vector<32x8xbf16>, vector<8x8xf32> -> vector<8x8xf32>
    %65 = arith.truncf %64 : vector<8x8xf32> to vector<8x8xbf16>
    %c0_30 = arith.constant 0 : index
    %c1 = arith.constant 1 : index
    %c0_31 = arith.constant 0 : index
    %c0_32 = arith.constant 0 : index
    %66 = vector.load %arg10[%c0_30, %c1, %c0_31, %c0_32] : memref<1x4x8x8xbf16, #tpu.memory_space<vmem>>, vector<1x1x8x8xbf16>
    %67 = vector.shape_cast %66 : vector<1x1x8x8xbf16> to vector<8x8xbf16>
    %68 = vector.shape_cast %65 : vector<8x8xbf16> to vector<1x1x8x8xbf16>
    tpu.vector_store %arg10[%c0_30, %c1, %c0_31, %c0_32], %68 {strides = array<i32>} : memref<1x4x8x8xbf16, #tpu.memory_space<vmem>>, vector<1x1x8x8xbf16>,
    %69 = vector.extract_strided_slice %18 {offsets = [0, 16], sizes = [8, 8], strides = [1, 1]} : vector<8x32xf32> to vector<8x8xf32>
    %70 = tpu.concatenate %69, %69, %69, %69 in 1 : vector<8x8xf32>, vector<8x8xf32>, vector<8x8xf32>, vector<8x8xf32> -> vector<8x32xf32>
    %71 = arith.mulf %70, %21 : vector<8x32xf32>
    %cst_33 = arith.constant dense<0.000000e+00> : vector<8x4xf32>
    %72 = tpu.matmul %71, %22, %cst_33 {dimension_numbers = #tpu.dot_dimension_numbers<[1], [0], [0], [1], [0, 0, 1, 1], [], []>} : vector<8x32xf32>, vector<32x4xf32>, vector<8x4xf32> -> vector<8x4xf32>
    %cst_34 = arith.constant dense<0xFF800000> : vector<8xf32>
    %73 = vector.multi_reduction <maximumf>, %72, %cst_34 [1] : vector<8x4xf32> to vector<8xf32>
    %74 = vector.shape_cast %73 : vector<8xf32> to vector<8x1xf32>
    %75 = vector.broadcast %74 : vector<8x1xf32> to vector<8x4xf32>
    %76 = arith.subf %72, %75 : vector<8x4xf32>
    %77 = math.exp %76 : vector<8x4xf32>
    %cst_35 = arith.constant dense<0.000000e+00> : vector<8xf32>
    %78 = vector.multi_reduction <add>, %77, %cst_35 [1] : vector<8x4xf32> to vector<8xf32>
    %79 = vector.shape_cast %78 : vector<8xf32> to vector<8x1xf32>
    %80 = tpu.reciprocal %79 {approx = true} : vector<8x1xf32> -> vector<8x1xf32>
    %81 = vector.broadcast %80 : vector<8x1xf32> to vector<8x4xf32>
    %82 = arith.mulf %77, %81 : vector<8x4xf32>
    %cst_36 = arith.constant dense<0.000000e+00> : vector<8x32xf32>
    %83 = tpu.matmul %82, %23, %cst_36 {dimension_numbers = #tpu.dot_dimension_numbers<[1], [0], [0], [1], [0, 0, 1, 1], [], []>} : vector<8x4xf32>, vector<4x32xf32>, vector<8x32xf32> -> vector<8x32xf32>
    %84 = arith.mulf %83, %11 : vector<8x32xf32>
    %85 = arith.truncf %84 : vector<8x32xf32> to vector<8x32xbf16>
    %cst_37 = arith.constant dense<0.000000e+00> : vector<8x8xf32>
    %86 = tpu.matmul %85, %24, %cst_37 {dimension_numbers = #tpu.dot_dimension_numbers<[1], [0], [0], [1], [0, 0, 1, 1], [], []>} : vector<8x32xbf16>, vector<32x8xbf16>, vector<8x8xf32> -> vector<8x8xf32>
    %87 = arith.truncf %86 : vector<8x8xf32> to vector<8x8xbf16>
    %c0_38 = arith.constant 0 : index
    %c2 = arith.constant 2 : index
    %c0_39 = arith.constant 0 : index
    %c0_40 = arith.constant 0 : index
    %88 = vector.load %arg10[%c0_38, %c2, %c0_39, %c0_40] : memref<1x4x8x8xbf16, #tpu.memory_space<vmem>>, vector<1x1x8x8xbf16>
    %89 = vector.shape_cast %88 : vector<1x1x8x8xbf16> to vector<8x8xbf16>
    %90 = vector.shape_cast %87 : vector<8x8xbf16> to vector<1x1x8x8xbf16>
    tpu.vector_store %arg10[%c0_38, %c2, %c0_39, %c0_40], %90 {strides = array<i32>} : memref<1x4x8x8xbf16, #tpu.memory_space<vmem>>, vector<1x1x8x8xbf16>,
    %91 = vector.extract_strided_slice %18 {offsets = [0, 24], sizes = [8, 8], strides = [1, 1]} : vector<8x32xf32> to vector<8x8xf32>
    %92 = tpu.concatenate %91, %91, %91, %91 in 1 : vector<8x8xf32>, vector<8x8xf32>, vector<8x8xf32>, vector<8x8xf32> -> vector<8x32xf32>
    %93 = arith.mulf %92, %21 : vector<8x32xf32>
    %cst_41 = arith.constant dense<0.000000e+00> : vector<8x4xf32>
    %94 = tpu.matmul %93, %22, %cst_41 {dimension_numbers = #tpu.dot_dimension_numbers<[1], [0], [0], [1], [0, 0, 1, 1], [], []>} : vector<8x32xf32>, vector<32x4xf32>, vector<8x4xf32> -> vector<8x4xf32>
    %cst_42 = arith.constant dense<0xFF800000> : vector<8xf32>
    %95 = vector.multi_reduction <maximumf>, %94, %cst_42 [1] : vector<8x4xf32> to vector<8xf32>
    %96 = vector.shape_cast %95 : vector<8xf32> to vector<8x1xf32>
    %97 = vector.broadcast %96 : vector<8x1xf32> to vector<8x4xf32>
    %98 = arith.subf %94, %97 : vector<8x4xf32>
    %99 = math.exp %98 : vector<8x4xf32>
    %cst_43 = arith.constant dense<0.000000e+00> : vector<8xf32>
    %100 = vector.multi_reduction <add>, %99, %cst_43 [1] : vector<8x4xf32> to vector<8xf32>
    %101 = vector.shape_cast %100 : vector<8xf32> to vector<8x1xf32>
    %102 = tpu.reciprocal %101 {approx = true} : vector<8x1xf32> -> vector<8x1xf32>
    %103 = vector.broadcast %102 : vector<8x1xf32> to vector<8x4xf32>
    %104 = arith.mulf %99, %103 : vector<8x4xf32>
    %cst_44 = arith.constant dense<0.000000e+00> : vector<8x32xf32>
    %105 = tpu.matmul %104, %23, %cst_44 {dimension_numbers = #tpu.dot_dimension_numbers<[1], [0], [0], [1], [0, 0, 1, 1], [], []>} : vector<8x4xf32>, vector<4x32xf32>, vector<8x32xf32> -> vector<8x32xf32>
    %106 = arith.mulf %105, %11 : vector<8x32xf32>
    %107 = arith.truncf %106 : vector<8x32xf32> to vector<8x32xbf16>
    %cst_45 = arith.constant dense<0.000000e+00> : vector<8x8xf32>
    %108 = tpu.matmul %107, %24, %cst_45 {dimension_numbers = #tpu.dot_dimension_numbers<[1], [0], [0], [1], [0, 0, 1, 1], [], []>} : vector<8x32xbf16>, vector<32x8xbf16>, vector<8x8xf32> -> vector<8x8xf32>
    %109 = arith.truncf %108 : vector<8x8xf32> to vector<8x8xbf16>
    %c0_46 = arith.constant 0 : index
    %c3 = arith.constant 3 : index
    %c0_47 = arith.constant 0 : index
    %c0_48 = arith.constant 0 : index
    %110 = vector.load %arg10[%c0_46, %c3, %c0_47, %c0_48] : memref<1x4x8x8xbf16, #tpu.memory_space<vmem>>, vector<1x1x8x8xbf16>
    %111 = vector.shape_cast %110 : vector<1x1x8x8xbf16> to vector<8x8xbf16>
    %112 = vector.shape_cast %109 : vector<8x8xbf16> to vector<1x1x8x8xbf16>
    tpu.vector_store %arg10[%c0_46, %c3, %c0_47, %c0_48], %112 {strides = array<i32>} : memref<1x4x8x8xbf16, #tpu.memory_space<vmem>>, vector<1x1x8x8xbf16>,
    return
  }
  func.func @transform_0(%arg0: i32, %arg1: i32) -> (i32, i32, i32) {
    %c0_i32 = arith.constant 0 : i32
    %c0_i32_0 = arith.constant 0 : i32
    return %arg0, %arg1, %c0_i32 : i32, i32, i32
  }
  func.func @transform_1(%arg0: i32, %arg1: i32) -> (i32, i32) {
    %c0_i32 = arith.constant 0 : i32
    %c0_i32_0 = arith.constant 0 : i32
    %c0_i32_1 = arith.constant 0 : i32
    return %c0_i32, %c0_i32_0 : i32, i32
  }
  func.func @transform_2(%arg0: i32, %arg1: i32) -> (i32, i32) {
    %c0_i32 = arith.constant 0 : i32
    %c0_i32_0 = arith.constant 0 : i32
    %c0_i32_1 = arith.constant 0 : i32
    return %c0_i32, %c0_i32_0 : i32, i32
  }
  func.func @transform_3(%arg0: i32, %arg1: i32) -> (i32, i32) {
    %c0_i32 = arith.constant 0 : i32
    %c0_i32_0 = arith.constant 0 : i32
    return %arg1, %c0_i32 : i32, i32
  }
  func.func @transform_4(%arg0: i32, %arg1: i32) -> (i32, i32) {
    %c0_i32 = arith.constant 0 : i32
    %c0_i32_0 = arith.constant 0 : i32
    return %arg1, %c0_i32 : i32, i32
  }
  func.func @transform_5(%arg0: i32, %arg1: i32) -> (i32, i32) {
    %c0_i32 = arith.constant 0 : i32
    %c0_i32_0 = arith.constant 0 : i32
    %c0_i32_1 = arith.constant 0 : i32
    return %c0_i32, %c0_i32_0 : i32, i32
  }
  func.func @transform_6(%arg0: i32, %arg1: i32) -> (i32, i32) {
    %c0_i32 = arith.constant 0 : i32
    %c0_i32_0 = arith.constant 0 : i32
    %c0_i32_1 = arith.constant 0 : i32
    return %c0_i32, %c0_i32_0 : i32, i32
  }
  func.func @transform_7(%arg0: i32, %arg1: i32) -> (i32, i32) {
    %c0_i32 = arith.constant 0 : i32
    %c0_i32_0 = arith.constant 0 : i32
    %c0_i32_1 = arith.constant 0 : i32
    return %c0_i32, %c0_i32_0 : i32, i32
  }
  func.func @transform_8(%arg0: i32, %arg1: i32) -> (i32, i32, i32, i32) {
    %c0_i32 = arith.constant 0 : i32
    %c0_i32_0 = arith.constant 0 : i32
    %c0_i32_1 = arith.constant 0 : i32
    return %arg0, %c0_i32, %arg1, %c0_i32_0 : i32, i32, i32, i32
  }
}

</mosaic_0001>

<bundles_post_ra>
// kernel: tpu_custom_call.1
= control target key start
LH: loop header
LB: loop body
LE: loop exit
PB: predicated region body
PF: predicated region fallthrough
CT: control target
= control target key end

     0   :  { %13 = vsyncpa [#allocation3], 0  ;;  %s2453_s0 = inlined_call_operand.vmem [shape: bf16[2,8,32], index: 0, kind: input, shape index: {}]   ;;  %s2454_s1 = inlined_call_operand.vmem [shape: bf16[32,160], index: 1, kind: input, shape index: {}]   ;;  %s2455_s2 = inlined_call_operand.hbm [shape: f32[1,160], index: 2, kind: input, shape index: {}]   ;;  %s2456_s3 = inlined_call_operand.vmem [shape: f32[8,8], index: 3, kind: input, shape index: {}]   ;;  %s2457_s4 = inlined_call_operand.vmem [shape: f32[8,8], index: 4, kind: input, shape index: {}]   ;;  %s2458_s5 = inlined_call_operand.vmem [shape: f32[32,4], index: 5, kind: input, shape index: {}]   ;;  %s2459_s6 = inlined_call_operand.hbm [shape: f32[4,32], index: 6, kind: input, shape index: {}]   ;;  %s2460_s7 = inlined_call_operand.vmem [shape: bf16[32,8], index: 7, kind: input, shape index: {}]   ;;  %s2461_s8 = inlined_call_operand.hbm [shape: bf16[2,4,8,8], index: 8, kind: output, shape index: {}]  }
   0x1   :  { %14 = vsyncpa [#allocation6], 0 }
   0x2   :  { %15 = vsyncpa [#allocation4], 0 }
   0x3   :  { %17 = vsyncpa [#allocation4 + $0x1], 0  ;;  %s2045_s27 = smov 0   ;;  %s2047_s28 = smov 0  }
   0x4   :  { %s2049_s29 = smov 0   ;;  %s2051_s30 = smov 0  }
   0x5   :  { %s2053_s9 = smov 0   ;;  %s2055_s10 = smov 0  }
   0x6 LB: > { %s1552_s11 = sadd.s32 4294967295, %s1982_s10   ;;  %s1553_s12 = sadd.s32 4294967294, %s1982_s10   ;;  %s1982_s10 = sphi %s2055_s10, %s23_s10   ;;  %s1978_s9 = sphi %s2053_s9, %s2485_s9   ;;  %s1974_s30 = sphi %s2051_s30, %s2484_s30   ;;  %s1970_s29 = sphi %s2049_s29, %s2483_s29   ;;  %s1966_s28 = sphi %s2047_s28, %s2482_s28   ;;  %s1962_s27 = sphi %s2045_s27, %s2481_s27  }
   0x7   : > { %s35_s13 = sadd.s32 1, %s1978_s9  ;;  %s229_s14 = sadd.s32 1, %s1970_s29 }
   0x8   : > { %p37_p0 = scmp.ge.s32.totalorder %s35_s13, 2  ;;  %p239_p1 = scmp.ne.s32.totalorder %s1970_s29, %s1966_s28 }
   0x9   : > { %p240_p2 = scmp.eq.s32.totalorder %s1552_s11, 1  ;;  %p245_p3 = scmp.ne.s32.totalorder %s1966_s28, %s1962_s27 }
   0xa   : > { %s2487_s13 = smov (%p37_p0, %s35_s13), 0  ;;  %p246_p5 = scmp.eq.s32.totalorder %s1553_s12, 1 }
   0xb   : > { %p2085_p4 = por %p240_p2, %p239_p1  ;;  %s224_s16 = ssub.s32 %s1978_s9, %s2487_s13 }
   0xc   : > { %p1554_p6 = scmp.ge.s32.totalorder %s1982_s10, 1  ;;  %p227_p7 = scmp.eq.s32.totalorder %s224_s16, 0 }
   0xd   : > { %s2470_s15 = scalar_select %p2085_p4, 1, 0 }
   0xe   : > { %p2092_p8 = por %p246_p5, %p245_p3  ;;  %p253_p9 = scmp.lt.s32.totalorder %s1982_s10, 3 }
   0xf   : > { %s2098_s18 = scalar_select %p227_p7, %s1970_s29, %s229_s14  }
  0x10   : > { %s2471_s17 = scalar_select %p2092_p8, 1, 0 }
  0x11   : > { %p2100_p10 = pnand %p1554_p6, %p253_p9  ;;  %p2104_p11 = scmp.eq.s32.totalorder %s1552_s11, 0 }
  0x12   : > { %s1984_s21 = smov [#allocation2]   ;;  %s1985_s23 = smov [#allocation5]  }
  0x13   : > { %s2472_s19 = scalar_select %p2100_p10, 1, 0 }
  0x14   : > { %s2473_s20 = scalar_select %p2104_p11, 1, 0 }
  0x15   : > { %p1743_p12 = pneg %p2100_p10  ;;  %s269_s22 = sshll.u32 %s1984_s21, 4  ;;  %s270_s22 = int_to_ptr.vmem [resolvable:$true] %s269_s22 }
  0x16   : > { %s297_s24 = sshll.u32 %s1985_s23, 4  ;;  %s1857_s26 = scalar_lea.vmem %s270_s22, 32  ;;  %s298_s24 = int_to_ptr.vmem [resolvable:$true] %s297_s24 }
  0x17   : > { %p2112_p13 = pnand %p2104_p11, %p1743_p12  ;;  %p1858_p1 = scmp.ne.s32.totalorder %s270_s22, %s1857_s26 }
  0x18   : > { %p1865_p5 = scmp.lt.s32.totalorder %s270_s22, %s270_s22  ;;  %p1866_p6 = scmp.lt.s32.totalorder %s1857_s26, %s1857_s26 }
  0x19   : > { %p1848_p0 = pneg %p2112_p13 }
  0x1a   : > { %p1867_p7 = por %p1866_p6, %p1865_p5 }
  0x1b   : > { %p1860_p2 = pnand %p1858_p1, %p1848_p0 }
  0x1d   : > { %p1861_p3 = pneg %p1860_p2 }
  0x1f   : > { %p1868_p9 = pnand %p1867_p7, %p1861_p3 }
  0x21   : > { %1871 = shalt.err (!%p1868_p9)
}
  0x22   : > { %1746 = dma.hbm_to_vmem [thread:$0]  (!%p2112_p13), %s2455_s2, 32, %s270_s22, [#allocation3]  }
  0x23   : > { %s1883_s14 = scalar_lea.vmem %s298_s24, 64  ;;  %p1891_p1 = scmp.lt.s32.totalorder %s298_s24, %s298_s24 }
  0x24   : > { %p1884_p12 = scmp.ne.s32.totalorder %s298_s24, %s1883_s14  ;;  %p1892_p2 = scmp.lt.s32.totalorder %s1883_s14, %s1883_s14 }
  0x26   : > { %p1886_p8 = pnand %p1884_p12, %p1848_p0  ;;  %p1893_p11 = por %p1892_p2, %p1891_p1 }
  0x28   : > { %p1887_p4 = pneg %p1886_p8 }
  0x2a   : > { %p1894_p10 = pnand %p1893_p11, %p1887_p4 }
  0x2c   : > { %1897 = shalt.err (!%p1894_p10)
}
  0x2d   : > { %1749 = dma.hbm_to_vmem [thread:$0]  (!%p2112_p13), %s2459_s6, 64, %s298_s24, [#allocation6]  }
  0x2e   : > { %p2475_p3 = scmp.ne.s32.totalorder %s2472_s19, 0 }
  0x2f   : > { %p2476_p5 = scmp.ne.s32.totalorder (!%p2475_p3), %s2473_s20, 0 }
  0x30   : > { %323 = sbr.rel (%p2475_p3) target bundleno = 2669 (0xa6d), region = 52 }
  0x35   : > { %1949 = dma.done.wait (%p2476_p5), [#allocation3], 32  }
  0x36   : > { %1951 = vsyncadd (%p2476_p5), [#allocation3], 4294967264 }
  0x37   : > { %1953 = dma.done.wait (%p2476_p5), [#allocation6], 64  }
  0x38   : > { %1955 = vsyncadd (%p2476_p5), [#allocation6], 4294967232  ;;  %v1986_v0 = vmov 0   ;;  %p371_p4 = scmp.lt.s32.totalorder %s1974_s30, 1  ;;  %v486_v1 = vld [vmem:[%s2457_s4] sm:$0xff]  ;;  %s2466_s24 = smov 8   ;;  %v394_v18 = vlaneseq }
  0x39   : > { %460 = vmatprep.mubr.bf16.mxu0 %v1986_v0  ;;  %488 = vrot.lane.b32.xlu0 %v486_v1, %s2466_s24  ;;  %s2468_s25 = smov 24   ;;  %v1822_v2 = vld [vmem:[%s2454_s1 + $0x14] ss:$8 sps:$4 sm:$0xff]   ;;  %v1824_v3 = vld [vmem:[%s2454_s1 + $0x10] ss:$8 sps:$4 sm:$0xff]   ;;  %v469_v6 = vld [vmem:[%s2456_s3] sm:$0xff] }
  0x3a   : > { %s372_s22 = scalar_select %p371_p4, %s1974_s30, 1  ;;  %494 = vrot.lane.b32.xlu1 %v486_v1, %s2468_s25  ;;  %v1825_v4 = vld [vmem:[%s2454_s1 + $0x4] ss:$8 sps:$4 sm:$0xff]   ;;  %440 = vmatprep.subr.bf16.mxu0 %v1822_v2  ;;  %v1827_v5 = vld [vmem:[%s2454_s1] ss:$8 sps:$4 sm:$0xff]   ;;  %vm424_vm0 = vcmask 261120  }
  0x3b   : > { %441 = vmatpush1.bf16.msra.mxu0 %v1824_v3  ;;  %s1989_s26 = smov 16   ;;  %s2477_s14 = smov 8   ;;  %vm480_vm1 = vcmask 64512   ;;  %vm482_vm2 = vcmask 130048   ;;  %vm484_vm3 = vcmask 195584   ;;  %v2179_v19 = vshrl.u32 %v394_v18, 7 }
  0x3c   : > { %s1564_s21 = sshll.u32 %s372_s22, 2  ;;  %442 = vmatprep.subr.bf16.mxu0 %v1825_v4  ;;  %s1990_s22 = smov 32   ;;  %v2182_v22 = vld [vmem:[#allocation2] sm:$0x3]  ;;  %v1992_v26 = vmov 0.0   ;;  %v2194_v35 = vld [vmem:[%s2458_s5 + $0x18] sm:$0xff] }
  0x3d   : > { %491 = vrot.lane.b32.xlu0 %v486_v1, %s1989_s26  ;;  %s377_s12 = scalar_lea.vmem %s2453_s0, %s1564_s21  ;;  %s1991_s24 = smov 96   ;;  %v396_v20 = vsub.s32 0, %v2179_v19  ;;  %1637 = vmatprep.subr.mxu1 %v1992_v26  ;;  %v2200_v36 = vld [vmem:[%s2458_s5 + $0x10] sm:$0xff]  ;;  %v2208_v37 = vld [vmem:[%s2458_s5 + $0x8] sm:$0xff]  ;;  %v2215_v38 = vld [vmem:[%s2458_s5] sm:$0xff]  ;;  %vm1994_vm4 = vmmov 0  }
  0x3e   : > { %471 = vrot.lane.b32.xlu1 %v469_v6, %s2477_s14  ;;  %v387_v7 = vld [vmem:[%s377_s12] sm:$0xf]  ;;  %s2478_s25 = smov 24   ;;  %s1993_s16 = smov 64   ;;  %1638 = vmatpush3.msra.mxu1 %v2194_v35  ;;  %vm625_vm5 = vcmask 31744   ;;  %vm640_vm6 = vcmask 1043456  }
  0x3f   : > { %443 = vmatpush1.bf16.msra.mxu0 %v1827_v5  ;;  %v397_v23 = vrot.slane %v2182_v22, %v396_v20  ;;  %1639 = vmatprep.subr.mxu1 %v1992_v26  ;;  %v2248_v62 = vld [vmem:[#allocation5] sm:$0xf]  ;;  %v2257_v63 = vld [vmem:[%s2460_s7 + $0x8] sm:$0xff]   ;;  %s368_s11 = sand.u32 1, %s1966_s28   ;;  %vm772_vm7 = vcmask 60416   ;;  %p2479_p10 = scmp.ne.s32.totalorder %s2470_s15, 0 }
  0x40   : > { %1653 = vmatprep.subr.bf16.mxu0 %v1992_v26  ;;  %1640 = vmatpush3.msra.mxu1 %v2200_v36  ;;  %s1563_s20 = sshll.u32 %s368_s11, 4  ;;  %s2406_s19 = scalar_lea.sflag [#allocation4], %s368_s11 }
  0x41   : > { %1641 = vmatprep.subr.mxu1 %v1992_v26  ;;  %1645 = vmatprep.mubr.msk.f32.mxu1 %vm1994_vm4, %v1992_v26  ;;  %s2330_s12 = scalar_lea.vmem [#allocation7], %s1563_s20  ;;  %s1998_s23 = smov [#allocation7]  }
  0x42   : > { %474 = vrot.lane.b32.xlu1 %v469_v6, %s1989_s26  ;;  %1569 = vmatmul.mubr.msk.bf16.vlgmr.msra.gmra.mxu0 %vm424_vm0, %v387_v7  ;;  %s1902_s20 = sshll.u32 %s1998_s23, 4  ;;  %s1903_s20 = int_to_ptr.vmem [resolvable:$false] %s1902_s20 }
  0x43   : > { %1642 = vmatpush3.msra.mxu1 %v2208_v37  ;;  %1657 = vmatprep.mubr.msk.bf16.mxu0 %vm1994_vm4, %v1992_v26 }
  0x44   : > { %1643 = vmatprep.subr.mxu1 %v1992_v26  ;;  %1654 = vmatpush3.bf16.msra.mxu0 %v2257_v63 }
  0x45   : > { %1644 = vmatpush3.msra.mxu1 %v2215_v38  ;;  %1655 = vmatprep.subr.bf16.mxu0 %v1992_v26 }
  0x46   : > { %1648 = vmatprep.subr.mxu1 %v1992_v26 }
  0xab   : > { %v489_v8 = vpop.permute.xlu0 %488 }
  0xac   : > { %v495_v9 = vpop.permute.xlu1 %494  ;;  %v497_v10 = vsel %vm480_vm1, %v486_v1, %v489_v8  ;;  %v2290_v8 = vld [vmem:[%s2460_s7] sm:$0xff]  }
  0xad   : > { %1656 = vmatpush3.bf16.msra.mxu0 %v2290_v8 }
  0xae   : > { %1685 = vmatprep.subr.mxu0 %v1992_v26 }
  0xaf   : > { %v492_v11 = vpop.permute.xlu0 %491 }
  0xb0   : > { %v498_v12 = vsel %vm482_vm2, %v497_v10, %v492_v11  ;;  %v472_v21 = vpop.permute.xlu1 %471 }
  0xb1   : > { %v499_v13 = vsel %vm484_vm3, %v498_v12, %v495_v9  ;;  %v481_v28 = vsel %vm480_vm1, %v469_v6, %v472_v21  ;;  %v400_v9 = vsub.s32 1, %v2179_v19 }
  0xb2   : > { %502 = vrot.lane.b32.xlu0 %v499_v13, %s1990_s22  ;;  %516 = vrot.lane.b32.xlu1 %v499_v13, %s1991_s24  ;;  %s1997_s22 = smov 104  }
  0xb3   : > { %v401_v10 = vrot.slane %v2182_v22, %v400_v9 }
  0xb4   : > { %v475_v24 = vpop.permute.xlu1 %474 }
  0xb5   : > { %v483_v31 = vsel %vm482_vm2, %v481_v28, %v475_v24 }
  0xb6   : > { %477 = vrot.lane.b32.xlu0 %v469_v6, %s2478_s25 }
 0x102   : > { %v462_v14 = vpop.f32.mrf.mxu0 }
 0x103   : > { %v463_v25 = vadd.f32 %v462_v14, %v397_v23 }
 0x104   : > { %v2177_v15 = vpop.f32.mrf.mxu0 }
 0x105   : > { %v2297_v11 = vadd.f32 %v2177_v15, %v401_v10 }
 0x106   : > { %v466_v16 = vpop.f32.mrf.mxu0 }
 0x108   : > { %v467_v17 = vpop.f32.mrf.mxu0 }
 0x124   : > { %v503_v27 = vpop.permute.xlu0 %502  ;;  %v517_v30 = vpop.permute.xlu1 %516 }
 0x125   : > { %v505_v29 = vmul.f32 %v503_v27, %v463_v25  ;;  %v519_v33 = vmul.f32 %v517_v30, %v463_v25 }
 0x127   : > { %507 = vrot.lane.b32.xlu0 %v505_v29, %s1991_s24 }
 0x128   : > { %v478_v32 = vpop.permute.xlu0 %477 }
 0x129   : > { %v485_v34 = vsel %vm484_vm3, %v483_v31, %v478_v32 }
 0x12a   : > { %512 = vrot.lane.b32.xlu1 %v485_v34, %s1993_s16  ;;  %v500_v39 = vmul.f32 %v485_v34, %v463_v25 }
 0x12b   : > { %521 = vrot.lane.b32.xlu0 %v519_v33, %s1991_s24  ;;  %s1425_s24 = sshll.u32 %s2330_s12, 4  ;;  %s2395_s24 = int_to_ptr.vmem [resolvable:$true] %s1425_s24 }
 0x12c   : > { %p1905_p0 = scmp.lt.s32.totalorder %s2395_s24, %s1903_s20 }
 0x199   : > { %v508_v40 = vpop.permute.xlu0 %507 }
 0x19a   : > { %v2223_v41 = vadd.f32 %v508_v40, %v500_v39 }
 0x19c   : > { %v513_v42 = vpop.permute.xlu1 %512  ;;  %538 = vrot.lane.b32.xlu0 %v2223_v41, %s1989_s26  ;;  %535 = vrot.lane.b32.xlu1 %v2223_v41, %s2477_s14  ;;  %s1995_s26 = smov 112   ;;  %s1996_s14 = smov 120  }
 0x19d   : > { %v515_v43 = vmul.f32 %v513_v42, %v463_v25  ;;  %v522_v44 = vpop.permute.xlu0 %521 }
 0x19f   : > { %v524_v45 = vadd.f32 %v522_v44, %v515_v43 }
 0x1a0   : > { %541 = vrot.lane.b32.xlu1 %v2223_v41, %s2478_s25 }
 0x1a1   : > { %548 = vrot.lane.b32.xlu0 %v524_v45, %s1993_s16 }
 0x20e   : > { %v539_v46 = vpop.permute.xlu0 %538  ;;  %v2232_v47 = vpop.permute.xlu1 %535 }
 0x20f   : > { %v544_v48 = vsel %vm480_vm1, %v2223_v41, %v2232_v47 }
 0x210   : > { %v545_v49 = vsel %vm482_vm2, %v544_v48, %v539_v46 }
 0x212   : > { %v542_v50 = vpop.permute.xlu1 %541 }
 0x213   : > { %v546_v51 = vsel %vm484_vm3, %v545_v49, %v542_v50  ;;  %v2239_v52 = vpop.permute.xlu0 %548 }
 0x214   : > { %v551_v53 = vmul.f32 %v2239_v52, %v546_v51 }
 0x216   : > { %1646 = vmatmul.mubr.msk.f32.vlgmr.msra.gmra.mxu1 %vm424_vm0, %v551_v53 }
 0x217   : > { %1650 = vmatprep.mubr.msk.f32.mxu1 %vm1994_vm4, %v1992_v26  ;;  %1649 = vmatpush3.msk.msra.mxu1 %vm640_vm6, %v2248_v62 }
 0x218   : > { %1661 = vmatprep.subr.mxu1 %v1992_v26 }
 0x2d6   : > { %v621_v54 = vpop.f32.mrf.mxu1 }
 0x2d7   : > { %v626_v55 = vsel %vm625_vm5, %v621_v54, -inf }
 0x2d8   : > { %627 = vmax.xlane.f32.xlu1 %v626_v55  ;;  %v1647_v56 = vpop.f32.mrf.mxu1 }
 0x2e9   : > { %986 = vrot.lane.b32.xlu1 %v2223_v41, %s1995_s26  ;;  %s1596_s26 = sshll.u32 %s1974_s30, 8  ;;  %s1898_s30 = scalar_lea.vmem %s2395_s24, 256 }
 0x2ea   : > { %s2400_s21 = scalar_lea.hbm %s2461_s8, %s1596_s26  ;;  %p1899_p8 = scmp.ne.s32.totalorder %s2395_s24, %s1898_s30 }
 0x2ec   : > { %p1900_p11 = pnand %p1899_p8, %p2479_p10 }
 0x2ee   : > { %p1901_p13 = pneg %p1900_p11 }
 0x361   : > { %v628_v57 = vpop.xlane.xlu1 %627 }
 0x362   : > { %v629_v58 = vsub.f32 %v621_v54, %v628_v57 }
 0x364   : > { %v630_v59 = vmul.f32 1.442695, %v629_v58 }
 0x365   : > { %v2299_v13 = vpop.permute.xlu1 %986 }
 0x366   : > { %1830 = vpow2.f32 %v630_v59 }
 0x373   : > { %v1831_v60 = vpop.eup %1830 }
 0x374   : > { %v632_v61 = vsel %vm625_vm5, %v1831_v60, 0.0 }
 0x375   : > { %633 = vadd.xlane.f32.xlu0 %v632_v61 }
 0x38b   : > { %774 = vrot.lane.b32.xlu0 %v2223_v41, %s1996_s14 }
 0x3fe   : > { %v634_v0 = vpop.xlane.xlu0 %633 }
 0x3ff   : > { %1832 = vrcp.f32 %v634_v0 }
 0x402   : > { %v2261_v1 = vpop.permute.xlu0 %774 }
 0x403   : > { %v777_v3 = vsel %vm480_vm1, %v2261_v1, %v2223_v41  ;;  %v989_v16 = vsel %vm480_vm1, %v2299_v13, %v2261_v1 }
 0x404   : > { %v778_v5 = vsel %vm482_vm2, %v777_v3, %v2232_v47  ;;  %v990_v20 = vsel %vm482_vm2, %v989_v16, %v2223_v41 }
 0x405   : > { %v779_v6 = vsel %vm484_vm3, %v778_v5, %v539_v46  ;;  %v991_v15 = vsel %vm484_vm3, %v990_v20, %v2232_v47 }
 0x406   : > { %v780_v7 = vmul.f32 %v779_v6, %v2239_v52  ;;  %v992_v22 = vmul.f32 %v991_v15, %v2239_v52 }
 0x40c   : > { %v1833_v2 = vpop.eup %1832 }
 0x40d   : > { %v636_v4 = vmul.f32 %v1833_v2, %v1831_v60 }
 0x40f   : > { %1651 = vmatmul.mubr.msk.f32.vlgmr.msra.gmra.mxu1 %vm625_vm5, %v636_v4 }
 0x410   : > { %1662 = vmatpush3.msra.mxu1 %v2194_v35  ;;  %1669 = vmatprep.mubr.msk.f32.mxu1 %vm1994_vm4, %v1992_v26 }
 0x411   : > { %1663 = vmatprep.subr.mxu1 %v1992_v26 }
 0x412   : > { %1664 = vmatpush3.msra.mxu1 %v2200_v36 }
 0x413   : > { %1665 = vmatprep.subr.mxu1 %v1992_v26 }
 0x414   : > { %1666 = vmatpush3.msra.mxu1 %v2208_v37 }
 0x415   : > { %1667 = vmatprep.subr.mxu1 %v1992_v26 }
 0x416   : > { %1668 = vmatpush3.msra.mxu1 %v2215_v38 }
 0x417   : > { %1670 = vmatmul.mubr.msk.f32.vlgmr.msra.gmra.mxu1 %vm424_vm0, %v780_v7  ;;  %1672 = vmatprep.subr.mxu1 %v1992_v26 }
 0x418   : > { %1673 = vmatpush3.msk.msra.mxu1 %vm640_vm6, %v2248_v62  ;;  %1674 = vmatprep.mubr.msk.f32.mxu1 %vm1994_vm4, %v1992_v26 }
 0x419   : > { %1677 = vmatprep.subr.bf16.mxu1 %v1992_v26 }
 0x4cf   : > { %v710_v12 = vpop.f32.mrf.mxu1 }
 0x4d0   : > { %v714_v14 = vmul.f32 %v710_v12, %v2297_v11 }
 0x4d1   : > { %v1652_v17 = vpop.f32.mrf.mxu1 }
 0x4d2   : > { %v715_v18 = vpack.c.bf16 %v714_v14, %v714_v14 }
 0x4d4   : > { %1658 = vmatmul.mubr.msk.bf16.vlgmr.msra.gmra.mxu0 %vm424_vm0, %v715_v18 }
 0x4d5   : > { %1686 = vmatpush3.msra.mxu0 %v2194_v35  ;;  %1693 = vmatprep.mubr.msk.f32.mxu0 %vm1994_vm4, %v1992_v26 }
 0x4d6   : > { %1687 = vmatprep.subr.mxu0 %v1992_v26 }
 0x4d7   : > { %v850_v19 = vpop.f32.mrf.mxu1  ;;  %1688 = vmatpush3.msra.mxu0 %v2200_v36 }
 0x4d8   : > { %1689 = vmatprep.subr.mxu0 %v1992_v26  ;;  %v854_v32 = vsel %vm625_vm5, %v850_v19, -inf }
 0x4d9   : > { %v1671_v21 = vpop.f32.mrf.mxu1  ;;  %1690 = vmatpush3.msra.mxu0 %v2208_v37 }
 0x4da   : > { %1691 = vmatprep.subr.mxu0 %v1992_v26 }
 0x4db   : > { %1692 = vmatpush3.msra.mxu0 %v2215_v38 }
 0x4dc   : > { %1694 = vmatmul.mubr.msk.f32.vlgmr.msra.gmra.mxu0 %vm424_vm0, %v992_v22  ;;  %1696 = vmatprep.subr.mxu0 %v1992_v26 }
 0x4dd   : > { %1697 = vmatpush3.msk.msra.mxu0 %vm640_vm6, %v2248_v62  ;;  %1698 = vmatprep.mubr.msk.f32.mxu0 %vm1994_vm4, %v1992_v26 }
 0x4de   : > { %1709 = vmatprep.subr.mxu0 %v1992_v26 }
 0x594   : > { %v765_v23 = vpop.f32.mrf.mxu0 }
 0x595   : > { %v771_v24 = vpack.c.bf16 %v765_v23, %v765_v23 }
 0x596   : > { %v1659_v25 = vpop.f32.mrf.mxu0 }
 0x597   : > { %773 = vst.msk [vmem:[%s2330_s12] sm:$0xf] %vm772_vm7, %v771_v24 }
 0x598   : > { %v768_v27 = vpop.f32.mrf.mxu0 }
 0x59a   : > { %v1660_v28 = vpop.f32.mrf.mxu0 }
 0x59c   : > { %v1062_v29 = vpop.f32.mrf.mxu0 }
 0x59d   : > { %v1066_v30 = vsel %vm625_vm5, %v1062_v29, -inf }
 0x59e   : > { %1067 = vmax.xlane.f32.xlu1 %v1066_v30  ;;  %v1695_v31 = vpop.f32.mrf.mxu0 }
 0x5a2   : > { %855 = vmax.xlane.f32.xlu1 %v854_v32 }
 0x627   : > { %v1068_v33 = vpop.xlane.xlu1 %1067 }
 0x628   : > { %v1069_v34 = vsub.f32 %v1062_v29, %v1068_v33 }
 0x62a   : > { %v1070_v39 = vmul.f32 1.442695, %v1069_v34 }
 0x62b   : > { %v856_v40 = vpop.xlane.xlu1 %855 }
 0x62c   : > { %1834 = vpow2.f32 %v1070_v39  ;;  %v857_v42 = vsub.f32 %v850_v19, %v856_v40 }
 0x62e   : > { %v858_v43 = vmul.f32 1.442695, %v857_v42 }
 0x630   : > { %1836 = vpow2.f32 %v858_v43 }
 0x639   : > { %v1835_v44 = vpop.eup %1834 }
 0x63a   : > { %v1072_v45 = vsel %vm625_vm5, %v1835_v44, 0.0 }
 0x63b   : > { %1073 = vadd.xlane.f32.xlu0 %v1072_v45 }
 0x63d   : > { %v1837_v46 = vpop.eup %1836 }
 0x63e   : > { %v860_v47 = vsel %vm625_vm5, %v1837_v46, 0.0 }
 0x63f   : > { %861 = vadd.xlane.f32.xlu1 %v860_v47 }
 0x651   : > { %1198 = vrot.lane.b32.xlu0 %v2223_v41, %s1997_s22  ;;  %s1904_s22 = scalar_lea.vmem %s1903_s20, 512 }
 0x652   : > { %p1906_p6 = scmp.lt.s32.totalorder %s1904_s22, %s1898_s30 }
 0x654   : > { %p1907_p7 = por %p1906_p6, %p1905_p0 }
 0x656   : > { %p1908_p9 = pnand %p1907_p7, %p1901_p13 }
 0x6c4   : > { %v1074_v48 = vpop.xlane.xlu0 %1073 }
 0x6c5   : > { %1838 = vrcp.f32 %v1074_v48 }
 0x6c8   : > { %v862_v49 = vpop.xlane.xlu1 %861  ;;  %v1199_v50 = vpop.permute.xlu0 %1198 }
 0x6c9   : > { %1840 = vrcp.f32 %v862_v49  ;;  %v1201_v53 = vsel %vm480_vm1, %v1199_v50, %v2299_v13 }
 0x6ca   : > { %v1202_v55 = vsel %vm482_vm2, %v1201_v53, %v2261_v1 }
 0x6cb   : > { %v1203_v58 = vsel %vm484_vm3, %v1202_v55, %v2223_v41 }
 0x6d2   : > { %v1839_v51 = vpop.eup %1838 }
 0x6d3   : > { %v1076_v54 = vmul.f32 %v1839_v51, %v1835_v44 }
 0x6d5   : > { %1699 = vmatmul.mubr.msk.f32.vlgmr.msra.gmra.mxu0 %vm625_vm5, %v1076_v54 }
 0x6d6   : > { %v1841_v56 = vpop.eup %1840  ;;  %1710 = vmatpush3.msra.mxu0 %v2194_v35  ;;  %1717 = vmatprep.mubr.msk.f32.mxu0 %vm1994_vm4, %v1992_v26  ;;  %v1204_v35 = vmul.f32 %v1203_v58, %v2239_v52 }
 0x6d7   : > { %1711 = vmatprep.subr.mxu0 %v1992_v26  ;;  %v864_v57 = vmul.f32 %v1841_v56, %v1837_v46 }
 0x6d8   : > { %1712 = vmatpush3.msra.mxu0 %v2200_v36 }
 0x6d9   : > { %1713 = vmatprep.subr.mxu0 %v1992_v26  ;;  %1675 = vmatmul.mubr.msk.f32.vlgmr.msra.gmra.mxu1 %vm625_vm5, %v864_v57 }
 0x6da   : > { %1714 = vmatpush3.msra.mxu0 %v2208_v37  ;;  %1678 = vmatpush3.bf16.msra.mxu1 %v2257_v63 }
 0x6db   : > { %1715 = vmatprep.subr.mxu0 %v1992_v26  ;;  %1679 = vmatprep.subr.bf16.mxu1 %v1992_v26 }
 0x6dc   : > { %1716 = vmatpush3.msra.mxu0 %v2215_v38  ;;  %1681 = vmatprep.mubr.msk.bf16.mxu1 %vm1994_vm4, %v1992_v26 }
 0x6dd   : > { %1718 = vmatmul.mubr.msk.f32.vlgmr.msra.gmra.mxu0 %vm424_vm0, %v1204_v35  ;;  %1725 = vmatprep.subr.bf16.mxu0 %v1992_v26 }
 0x6de   : > { %1680 = vmatpush3.bf16.msra.mxu1 %v2290_v8  ;;  %1726 = vmatpush3.bf16.msra.mxu0 %v2257_v63 }
 0x6df   : > { %1701 = vmatprep.subr.bf16.mxu1 %v1992_v26  ;;  %1727 = vmatprep.subr.bf16.mxu0 %v1992_v26 }
 0x6e0   : > { %1729 = vmatprep.mubr.msk.bf16.mxu0 %vm1994_vm4, %v1992_v26 }
 0x6e2   : > { %1728 = vmatpush3.bf16.msra.mxu0 %v2290_v8 }
 0x795   : > { %v1146_v36 = vpop.f32.mrf.mxu0 }
 0x796   : > { %v1150_v1 = vmul.f32 %v1146_v36, %v2297_v11 }
 0x797   : > { %v1700_v37 = vpop.f32.mrf.mxu0 }
 0x798   : > { %v1151_v2 = vpack.c.bf16 %v1150_v1, %v1150_v1 }
 0x799   : > { %v934_v38 = vpop.f32.mrf.mxu1 }
 0x79a   : > { %v938_v41 = vmul.f32 %v934_v38, %v2297_v11 }
 0x79b   : > { %v1676_v52 = vpop.f32.mrf.mxu1 }
 0x79c   : > { %v939_v59 = vpack.c.bf16 %v938_v41, %v938_v41 }
 0x79d   : > { %v1274_v60 = vpop.f32.mrf.mxu0 }
 0x79e   : > { %v1278_v61 = vsel %vm625_vm5, %v1274_v60, -inf  ;;  %1682 = vmatmul.mubr.msk.bf16.vlgmr.msra.gmra.mxu1 %vm424_vm0, %v939_v59 }
 0x79f   : > { %v1719_v0 = vpop.f32.mrf.mxu0  ;;  %1279 = vmax.xlane.f32.xlu1 %v1278_v61  ;;  %1702 = vmatpush3.bf16.msra.mxu1 %v2257_v63 }
 0x7a0   : > { %1703 = vmatprep.subr.bf16.mxu1 %v1992_v26  ;;  %1705 = vmatprep.mubr.msk.bf16.mxu1 %vm1994_vm4, %v1992_v26 }
 0x7a3   : > { %1704 = vmatpush3.bf16.msra.mxu1 %v2290_v8 }
 0x7a4   : > { %1720 = vmatprep.subr.mxu1 %v1992_v26 }
 0x7a6   : > { %1706 = vmatmul.mubr.msk.bf16.vlgmr.msra.gmra.mxu1 %vm424_vm0, %v1151_v2 }
 0x7a7   : > { %1721 = vmatpush3.msk.msra.mxu1 %vm640_vm6, %v2248_v62  ;;  %1722 = vmatprep.mubr.msk.f32.mxu1 %vm1994_vm4, %v1992_v26 }
 0x828   : > { %v1280_v63 = vpop.xlane.xlu1 %1279 }
 0x829   : > { %v1281_v3 = vsub.f32 %v1274_v60, %v1280_v63 }
 0x82b   : > { %v1282_v4 = vmul.f32 1.442695, %v1281_v3 }
 0x82d   : > { %1842 = vpow2.f32 %v1282_v4 }
 0x83a   : > { %v1843_v5 = vpop.eup %1842 }
 0x83b   : > { %v1284_v6 = vsel %vm625_vm5, %v1843_v5, 0.0 }
 0x83c   : > { %1285 = vadd.xlane.f32.xlu1 %v1284_v6 }
 0x85e   : > { %v977_v7 = vpop.f32.mrf.mxu1 }
 0x85f   : > { %v983_v8 = vpack.c.bf16 %v977_v7, %v977_v7 }
 0x860   : > { %v1683_v9 = vpop.f32.mrf.mxu1 }
 0x861   : > { %1580 = vst.msk [vmem:[%s2330_s12 + $0x4] sm:$0xf] %vm772_vm7, %v983_v8 }
 0x862   : > { %v980_v10 = vpop.f32.mrf.mxu1 }
 0x864   : > { %v1684_v12 = vpop.f32.mrf.mxu1 }
 0x866   : > { %v1189_v62 = vpop.f32.mrf.mxu1 }
 0x867   : > { %v1195_v13 = vpack.c.bf16 %v1189_v62, %v1189_v62 }
 0x868   : > { %v1707_v26 = vpop.f32.mrf.mxu1 }
 0x869   : > { %1585 = vst.msk [vmem:[%s2330_s12 + $0x8] sm:$0xf] %vm772_vm7, %v1195_v13 }
 0x86a   : > { %v1192_v14 = vpop.f32.mrf.mxu1 }
 0x86c   : > { %v1708_v16 = vpop.f32.mrf.mxu1 }
 0x8c5   : > { %v1286_v17 = vpop.xlane.xlu1 %1285 }
 0x8c6   : > { %1844 = vrcp.f32 %v1286_v17 }
 0x8d3   : > { %v1845_v18 = vpop.eup %1844 }
 0x8d4   : > { %v1288_v20 = vmul.f32 %v1845_v18, %v1843_v5 }
 0x8d6   : > { %1723 = vmatmul.mubr.msk.f32.vlgmr.msra.gmra.mxu1 %vm625_vm5, %v1288_v20 }
 0x996   : > { %v1358_v15 = vpop.f32.mrf.mxu1 }
 0x997   : > { %v1362_v19 = vmul.f32 %v1358_v15, %v2297_v11 }
 0x998   : > { %v1724_v21 = vpop.f32.mrf.mxu1 }
 0x999   : > { %v1363_v22 = vpack.c.bf16 %v1362_v19, %v1362_v19 }
 0x99b   : > { %1730 = vmatmul.mubr.msk.bf16.vlgmr.msra.gmra.mxu0 %vm424_vm0, %v1363_v22 }
 0xa5b   : > { %v1401_v23 = vpop.f32.mrf.mxu0 }
 0xa5c   : > { %v1407_v24 = vpack.c.bf16 %v1401_v23, %v1401_v23 }
 0xa5d   : > { %v1731_v11 = vpop.f32.mrf.mxu0 }
 0xa5e   : > { %1590 = vst.msk [vmem:[%s2330_s12 + $0xc] sm:$0xf] %vm772_vm7, %v1407_v24 }
 0xa5f   : > { %v1404_v25 = vpop.f32.mrf.mxu0 }
 0xa60   : > { %1911 = shalt.err (!%p1908_p9)
}
 0xa61   : > { %s1912_s11 = scalar_lea.hbm %s2400_s21, 256  ;;  %s1916_s14 = scalar_lea.hbm %s2461_s8, 512 }
 0xa62   : > { %p1913_p12 = scmp.ne.s32.totalorder %s2400_s21, %s1912_s11  ;;  %p1917_p3 = scmp.lt.s32.totalorder %s2400_s21, %s2461_s8 }
 0xa63   : > { %p1918_p5 = scmp.lt.s32.totalorder %s1916_s14, %s1912_s11 }
 0xa64   : > { %p1914_p1 = pnand %p1913_p12, %p2479_p10 }
 0xa65   : > { %p1919_p4 = por %p1918_p5, %p1917_p3 }
 0xa66   : > { %p1915_p2 = pneg %p1914_p1 }
 0xa68   : > { %p1920_p8 = pnand %p1919_p4, %p1915_p2 }
 0xa6a   : > { %1923 = shalt.err (!%p1920_p8)
}
 0xa6b   : > { %s1999_s30 = smov 4   ;;  %v1732_v27 = vpop.f32.mrf.mxu0 }
 0xa6c   : > { %1741 = dma.vmem_to_hbm [thread:$0]  (%p2479_p10), %s2395_s24, 256, %s2400_s21, %s2406_s19, %s1993_s16, %s1993_s16, %s1999_s30  }
 0xa6d PF: > { %p1758_p11 = scmp.ge.s32.totalorder %s1982_s10, 2  ;;  %s1440_s20 = sand.u32 1, %s1962_s27  }
 0xa6e   : > { %p2480_p13 = scmp.ne.s32.totalorder %s2471_s17, 0  ;;  %s1441_s22 = scalar_lea.sflag [#allocation4], %s1440_s20 }
 0xa70   : > { %p1751_p0 = pnand %p1758_p11, %p2480_p13 }
 0xa72   : > { %p1752_p6 = pneg %p1751_p0 }
 0xa74   : > { %1957 = dma.done.wait (%p1752_p6), %s1441_s22, 256  }
 0xa75   : > { %1959 = vsyncadd (%p1752_p6), %s1441_s22, 4294967040  ;;  %s23_s10 = sadd.s32 1, %s1982_s10   ;;  %s2481_s27 = smov %s1966_s28 }
 0xa76   : > { %p20_p7 = scmp.ge.s32.totalorder %s23_s10, 4   ;;  %s2482_s28 = smov %s1970_s29 }
 0xa77   : > { %s2483_s29 = smov %s2098_s18  ;;  %s2484_s30 = smov %s1978_s9 }
 0xa78   : > { %s2485_s9 = smov %s2487_s13  ;;  %22 = sbr.rel (!%p20_p7) target bundleno = 6 (0x6), region = 105 }
 0xa7d   :  { %1446 = vsyncpa [#allocation3], 1 }
 0xa7e   :  { %1448 = vsyncpa [#allocation3 + $0x1], 1 }
 0xa7f   :  { %1449 = vsyncpa [#allocation6], 1 }
 0xa80   :  { %1450 = vsyncpa [#allocation4], 1 }
 0xa81   :  { %1452 = vsyncpa [#allocation4 + $0x1], 1 }

</bundles_post_ra>
